<compile_context>
chip_gen: v7x
topology: tpu7x:2x2x1
jax: 0.10.0
libtpu: 0.0.40
codegen_flags: <defaults>
</compile_context>

<pallas_src>
import functools

import jax
import jax.numpy as jnp
from jax.experimental import pallas as pl
from jax.experimental.pallas import tpu as pltpu


MXU_DTYPE = jnp.float32   # set to jnp.bfloat16 on v6e/v7x for large batches


def _ru(x, m):
    return (x + m - 1) // m * m


# ----------------------------------------------------------------------------
# Pallas kernel: fused  out = relu?(x @ w + b)   (M-tiled grid, padded K/N)
# ----------------------------------------------------------------------------
def _gemm_bias_act_kernel(x_ref, w_ref, b_ref, o_ref, *, relu, mxu_dtype):
    x = x_ref[...].astype(mxu_dtype)
    w = w_ref[...].astype(mxu_dtype)
    y = jnp.dot(x, w, preferred_element_type=jnp.float32)
    y = y + b_ref[...]                       # (1, Np) broadcasts over rows
    if relu:
        y = jnp.maximum(y, 0.0)
    o_ref[...] = y.astype(o_ref.dtype)


def pallas_linear(x, w, b, relu=False, mxu_dtype=MXU_DTYPE,
                  vmem_budget=8 << 20):
    """x: (M, K), w: (K, N), b: (N,)  ->  (M, N) f32, all padding internal."""
    M, K = x.shape
    K2, N = w.shape
    assert K == K2, (K, K2)

    Kp = _ru(K, 128)          # lane-dense contraction feed (zeros are inert)
    Np = _ru(N, 128)          # lane-dense output -> unmasked vector stores

    # Tile M: stay well under v5e's 16 MiB scoped-VMEM default (double-buffered
    # x/out tiles + resident weights), and prefer >= 2 tiles so the "parallel"
    # grid axis can shard across v7x's two TensorCores.
    m8 = _ru(M, 8)
    tm_cap = (vmem_budget // 4 - Kp * Np) // (2 * (Kp + Np))
    tm = max(8, min(512, (tm_cap // 8) * 8, m8))
    if m8 > 8 and tm >= m8:
        tm = max(8, _ru(m8 // 2, 8))
    Mp = _ru(m8, tm)

    xf = x.astype(jnp.float32)
    xp = jnp.pad(xf, ((0, Mp - M), (0, Kp - K)))
    wp = jnp.pad(w.astype(jnp.float32), ((0, Kp - K), (0, Np - N)))
    bp = jnp.pad(b.reshape(1, N).astype(jnp.float32), ((0, 0), (0, Np - N)))

    need = 4 * (2 * tm * (Kp + Np) + Kp * Np + Np)
    out = pl.pallas_call(
        functools.partial(_gemm_bias_act_kernel, relu=relu, mxu_dtype=mxu_dtype),
        out_shape=jax.ShapeDtypeStruct((Mp, Np), jnp.float32),
        grid=(Mp // tm,),
        in_specs=[
            pl.BlockSpec((tm, Kp), lambda i: (i, 0)),
            pl.BlockSpec((Kp, Np), lambda i: (0, 0)),   # weights resident
            pl.BlockSpec((1, Np), lambda i: (0, 0)),    # bias resident
        ],
        out_specs=pl.BlockSpec((tm, Np), lambda i: (i, 0)),
        compiler_params=pltpu.CompilerParams(
            dimension_semantics=("parallel",),
            vmem_limit_bytes=int(max(2 << 20, min(16 << 20, 8 * need))),
        ),
    )(xp, wp, bp)
    return out[:M, :N]


# ----------------------------------------------------------------------------
# Fused head kernel: fc_mu + cat([z, act]) + the full q-MLP in ONE pallas_call
# ----------------------------------------------------------------------------
def _head_kernel(*refs, n_rest, mxu_dtype):
    # refs = (flat, act, w_mu, b_mu, w1z, w1a, b1, [w_i, b_i]*n_rest, out)
    flat_ref, act_ref, wmu_ref, bmu_ref, w1z_ref, w1a_ref, b1_ref = refs[:7]
    rest = refs[7:-1]
    o_ref = refs[-1]

    def mm(a, b):
        return jnp.dot(a.astype(mxu_dtype), b.astype(mxu_dtype),
                       preferred_element_type=jnp.float32)

    # VAE fc_mu (latent mean)
    z = mm(flat_ref[...], wmu_ref[...]) + bmu_ref[...]
    # first MLP layer on cat([z, act]):   concat == split matmuls
    h = mm(z, w1z_ref[...]) + mm(act_ref[...], w1a_ref[...]) + b1_ref[...]
    h = jnp.maximum(h, 0.0)
    # remaining MLP layers: activation on hidden layers only (last = identity)
    for li in range(n_rest):
        w_ref, b_ref = rest[2 * li], rest[2 * li + 1]
        h = mm(h, w_ref[...]) + b_ref[...]
        if li < n_rest - 1:
            h = jnp.maximum(h, 0.0)
    o_ref[...] = h.astype(o_ref.dtype)


def pallas_q_head(flat, act, params, mxu_dtype=MXU_DTYPE):
    B, F = flat.shape
    A = act.shape[1]
    Bp = _ru(B, 8)            # sublane-pad the batch
    Fp = _ru(F, 128)
    Ap = _ru(A, 128)

    w_mu, b_mu = params["fc_mu_w"], params["fc_mu_b"]
    L = w_mu.shape[1]
    mlp = params["mlp"]
    assert len(mlp) >= 2
    (w1, b1), rest = mlp[0], mlp[1:]
    H1 = w1.shape[1]

    flat_p = jnp.pad(flat.astype(jnp.float32), ((0, Bp - B), (0, Fp - F)))
    act_p = jnp.pad(act.astype(jnp.float32), ((0, Bp - B), (0, Ap - A)))
    wmu_p = jnp.pad(w_mu, ((0, Fp - F), (0, 0)))
    bmu_r = b_mu.reshape(1, L)
    w1z = w1[:L, :]                                        # rows acting on z
    w1a = jnp.pad(w1[L:, :], ((0, Ap - A), (0, 0)))        # rows acting on act
    b1_r = b1.reshape(1, H1)

    ops = [flat_p, act_p, wmu_p, bmu_r, w1z, w1a, b1_r]
    last = len(rest) - 1
    for li, (w, b) in enumerate(rest):
        n = w.shape[1]
        if li == last:
            # final N=1 layer -> zero-pad to 128 lanes for a lane-dense store
            npad = _ru(n, 128)
            w = jnp.pad(w, ((0, 0), (0, npad - n)))
            b = jnp.pad(b, (0, npad - n))
            n = npad
        ops += [w, b.reshape(1, n)]
    Nout = ops[-1].shape[1]

    in_specs = [pl.BlockSpec(op.shape, lambda i: (0, 0)) for op in ops]
    out = pl.pallas_call(
        functools.partial(_head_kernel, n_rest=len(rest), mxu_dtype=mxu_dtype),
        out_shape=jax.ShapeDtypeStruct((Bp, Nout), jnp.float32),
        grid=(1,),
        in_specs=in_specs,
        out_specs=pl.BlockSpec((Bp, Nout), lambda i: (0, 0)),
        compiler_params=pltpu.CompilerParams(vmem_limit_bytes=8 << 20),
    )(*ops)
    return out[:B, 0]                                       # == squeeze(q, -1)


# ----------------------------------------------------------------------------
# Conv2d (stride, pad) = im2col (XLA glue) + fused Pallas GEMM (hot path)
# ----------------------------------------------------------------------------
def _im2col_nhwc(x, k, stride, pad):
    N, H, W, C = x.shape
    xp = jnp.pad(x, ((0, 0), (pad, pad), (pad, pad), (0, 0)))
    Ho = (H + 2 * pad - k) // stride + 1
    Wo = (W + 2 * pad - k) // stride + 1
    cols = []
    for i in range(k):
        for j in range(k):
            cols.append(xp[:, i:i + stride * Ho:stride, j:j + stride * Wo:stride, :])
    cols = jnp.concatenate(cols, axis=-1)          # (N, Ho, Wo, k*k*C)
    return cols.reshape(N * Ho * Wo, k * k * C), Ho, Wo


def conv2d_relu(x_nhwc, w_kkcio, b, stride, pad):
    """w_kkcio: (k, k, Cin, Cout) — row order matches the im2col column order."""
    k, _, Cin, Cout = w_kkcio.shape
    cols, Ho, Wo = _im2col_nhwc(x_nhwc, k, stride, pad)
    w_mat = w_kkcio.reshape(k * k * Cin, Cout)
    y = pallas_linear(cols, w_mat, b, relu=True)
    return y.reshape(x_nhwc.shape[0], Ho, Wo, Cout)


# ----------------------------------------------------------------------------
# Parameter construction (deterministic, synthetic)
# ----------------------------------------------------------------------------
def init_params(key, obs_dim, act_dim, latent_dim, hidden_sizes):
    C, H, W = obs_dim
    ks = jax.random.split(key, 16)
    it = iter(range(16))

    def dense(k, fan_in, fan_out):
        scale = 1.0 / jnp.sqrt(fan_in)
        return jax.random.uniform(k, (fan_in, fan_out), jnp.float32, -scale, scale)

    params = {}
    c1, c2 = 8, 16
    params["conv1_w"] = 0.1 * jax.random.normal(ks[next(it)], (3, 3, C, c1), jnp.float32)
    params["conv1_b"] = jnp.zeros((c1,), jnp.float32)
    params["conv2_w"] = 0.1 * jax.random.normal(ks[next(it)], (3, 3, c1, c2), jnp.float32)
    params["conv2_b"] = jnp.zeros((c2,), jnp.float32)
    # NOTE: fc_mu_w rows follow the NHWC flatten order used below; porting real
    # PyTorch (NCHW-flatten) checkpoint weights would require a row permutation.
    flat_dim = c2 * (H // 4) * (W // 4)
    params["fc_mu_w"] = dense(ks[next(it)], flat_dim, latent_dim)
    params["fc_mu_b"] = jnp.zeros((latent_dim,), jnp.float32)

    sizes = [latent_dim + act_dim] + list(hidden_sizes) + [1]
    mlp = []
    for fi, fo in zip(sizes[:-1], sizes[1:]):
        mlp.append((dense(ks[next(it)], fi, fo), jnp.zeros((fo,), jnp.float32)))
    params["mlp"] = mlp
    return params


# ----------------------------------------------------------------------------
# VAECritic forward
# ----------------------------------------------------------------------------
def vae_critic_forward(params, obs_nchw, act):
    # obs arrives NCHW (PyTorch convention); compute runs in NHWC.
    x = jnp.transpose(obs_nchw, (0, 2, 3, 1)).astype(jnp.float32)
    x = conv2d_relu(x, params["conv1_w"], params["conv1_b"], stride=2, pad=1)
    x = conv2d_relu(x, params["conv2_w"], params["conv2_b"], stride=2, pad=1)
    flat = x.reshape(x.shape[0], -1)       # NHWC flatten, matches fc_mu_w rows
    # fc_mu + cat([z, act]) + entire q-MLP fused in one pallas_call
    return pallas_q_head(flat, act.astype(jnp.float32), params)


if __name__ == "__main__":
    key = jax.random.PRNGKey(0)
    k_obs, k_act, k_par = jax.random.split(key, 3)

    B = 2
    obs_dim = (4, 16, 16)     # (C, H, W)
    act_dim = 3
    latent_dim = 16
    hidden_sizes = [32, 32]

    obs = jax.random.normal(k_obs, (B,) + obs_dim, jnp.float32)   # NCHW
    act = jax.random.normal(k_act, (B, act_dim), jnp.float32)

    params = init_params(k_par, obs_dim, act_dim, latent_dim, hidden_sizes)

    fwd = jax.jit(vae_critic_forward)
    q = jax.block_until_ready(fwd(params, obs, act))
    assert q.shape == (B,), q.shape
    assert q.dtype == jnp.float32
    assert bool(jnp.all(jnp.isfinite(q)))
    print("KERNEL_OK")
</pallas_src>

<mosaic_0001>
module attributes {stable_mosaic.version = 11 : i64} {
  func.func @_gemm_bias_act_kernel(%arg0: i32, %arg1: memref<64x128xf32, #tpu.memory_space<vmem>>, %arg2: memref<128x128xf32, #tpu.memory_space<vmem>>, %arg3: memref<1x128xf32, #tpu.memory_space<vmem>>, %arg4: memref<64x128xf32, #tpu.memory_space<vmem>>) attributes {dimension_semantics = [#tpu.dimension_semantics<parallel>], iteration_bounds = array<i64: 2>, scalar_prefetch = 0 : i64, scratch_operands = 0 : i64, tpu.core_type = #tpu.core_type<tc>, window_params = [{transform_indices = @transform_0, window_bounds = array<i64: 64, 128>}, {pipeline_mode = #tpu.pipeline_mode<synchronous>, transform_indices = @transform_1, window_bounds = array<i64: 128, 128>}, {pipeline_mode = #tpu.pipeline_mode<synchronous>, transform_indices = @transform_2, window_bounds = array<i64: 1, 128>}, {transform_indices = @transform_3, window_bounds = array<i64: 64, 128>}]} {
    %c0 = arith.constant 0 : index
    %c0_0 = arith.constant 0 : index
    %0 = vector.load %arg1[%c0, %c0_0] : memref<64x128xf32, #tpu.memory_space<vmem>>, vector<64x128xf32>
    %c0_1 = arith.constant 0 : index
    %c0_2 = arith.constant 0 : index
    %1 = vector.load %arg2[%c0_1, %c0_2] : memref<128x128xf32, #tpu.memory_space<vmem>>, vector<128x128xf32>
    %cst = arith.constant dense<0.000000e+00> : vector<64x128xf32>
    %2 = tpu.matmul %0, %1, %cst {dimension_numbers = #tpu.dot_dimension_numbers<[1], [0], [0], [1], [0, 0, 1, 1], [], []>} : vector<64x128xf32>, vector<128x128xf32>, vector<64x128xf32> -> vector<64x128xf32>
    %c0_3 = arith.constant 0 : index
    %c0_4 = arith.constant 0 : index
    %3 = vector.load %arg3[%c0_3, %c0_4] : memref<1x128xf32, #tpu.memory_space<vmem>>, vector<1x128xf32>
    %4 = vector.broadcast %3 : vector<1x128xf32> to vector<64x128xf32>
    %5 = arith.addf %2, %4 : vector<64x128xf32>
    %cst_5 = arith.constant 0.000000e+00 : f32
    %6 = vector.broadcast %cst_5 : f32 to vector<64x128xf32>
    %7 = arith.maximumf %5, %6 : vector<64x128xf32>
    %c0_6 = arith.constant 0 : index
    %c0_7 = arith.constant 0 : index
    %8 = vector.load %arg4[%c0_6, %c0_7] : memref<64x128xf32, #tpu.memory_space<vmem>>, vector<64x128xf32>
    tpu.vector_store %arg4[%c0_6, %c0_7], %7 {strides = array<i32>} : memref<64x128xf32, #tpu.memory_space<vmem>>, vector<64x128xf32>,
    return
  }
  func.func @transform_0(%arg0: i32) -> (i32, i32) {
    %c0_i32 = arith.constant 0 : i32
    %c0_i32_0 = arith.constant 0 : i32
    return %arg0, %c0_i32 : i32, i32
  }
  func.func @transform_1(%arg0: i32) -> (i32, i32) {
    %c0_i32 = arith.constant 0 : i32
    %c0_i32_0 = arith.constant 0 : i32
    %c0_i32_1 = arith.constant 0 : i32
    return %c0_i32, %c0_i32_0 : i32, i32
  }
  func.func @transform_2(%arg0: i32) -> (i32, i32) {
    %c0_i32 = arith.constant 0 : i32
    %c0_i32_0 = arith.constant 0 : i32
    %c0_i32_1 = arith.constant 0 : i32
    return %c0_i32, %c0_i32_0 : i32, i32
  }
  func.func @transform_3(%arg0: i32) -> (i32, i32) {
    %c0_i32 = arith.constant 0 : i32
    %c0_i32_0 = arith.constant 0 : i32
    return %arg0, %c0_i32 : i32, i32
  }
}

module attributes {stable_mosaic.version = 11 : i64} {
  func.func @_gemm_bias_act_kernel(%arg0: i32, %arg1: memref<16x128xf32, #tpu.memory_space<vmem>>, %arg2: memref<128x128xf32, #tpu.memory_space<vmem>>, %arg3: memref<1x128xf32, #tpu.memory_space<vmem>>, %arg4: memref<16x128xf32, #tpu.memory_space<vmem>>) attributes {dimension_semantics = [#tpu.dimension_semantics<parallel>], iteration_bounds = array<i64: 2>, scalar_prefetch = 0 : i64, scratch_operands = 0 : i64, tpu.core_type = #tpu.core_type<tc>, window_params = [{transform_indices = @transform_0, window_bounds = array<i64: 16, 128>}, {pipeline_mode = #tpu.pipeline_mode<synchronous>, transform_indices = @transform_1, window_bounds = array<i64: 128, 128>}, {pipeline_mode = #tpu.pipeline_mode<synchronous>, transform_indices = @transform_2, window_bounds = array<i64: 1, 128>}, {transform_indices = @transform_3, window_bounds = array<i64: 16, 128>}]} {
    %c0 = arith.constant 0 : index
    %c0_0 = arith.constant 0 : index
    %0 = vector.load %arg1[%c0, %c0_0] : memref<16x128xf32, #tpu.memory_space<vmem>>, vector<16x128xf32>
    %c0_1 = arith.constant 0 : index
    %c0_2 = arith.constant 0 : index
    %1 = vector.load %arg2[%c0_1, %c0_2] : memref<128x128xf32, #tpu.memory_space<vmem>>, vector<128x128xf32>
    %cst = arith.constant dense<0.000000e+00> : vector<16x128xf32>
    %2 = tpu.matmul %0, %1, %cst {dimension_numbers = #tpu.dot_dimension_numbers<[1], [0], [0], [1], [0, 0, 1, 1], [], []>} : vector<16x128xf32>, vector<128x128xf32>, vector<16x128xf32> -> vector<16x128xf32>
    %c0_3 = arith.constant 0 : index
    %c0_4 = arith.constant 0 : index
    %3 = vector.load %arg3[%c0_3, %c0_4] : memref<1x128xf32, #tpu.memory_space<vmem>>, vector<1x128xf32>
    %4 = vector.broadcast %3 : vector<1x128xf32> to vector<16x128xf32>
    %5 = arith.addf %2, %4 : vector<16x128xf32>
    %cst_5 = arith.constant 0.000000e+00 : f32
    %6 = vector.broadcast %cst_5 : f32 to vector<16x128xf32>
    %7 = arith.maximumf %5, %6 : vector<16x128xf32>
    %c0_6 = arith.constant 0 : index
    %c0_7 = arith.constant 0 : index
    %8 = vector.load %arg4[%c0_6, %c0_7] : memref<16x128xf32, #tpu.memory_space<vmem>>, vector<16x128xf32>
    tpu.vector_store %arg4[%c0_6, %c0_7], %7 {strides = array<i32>} : memref<16x128xf32, #tpu.memory_space<vmem>>, vector<16x128xf32>,
    return
  }
  func.func @transform_0(%arg0: i32) -> (i32, i32) {
    %c0_i32 = arith.constant 0 : i32
    %c0_i32_0 = arith.constant 0 : i32
    return %arg0, %c0_i32 : i32, i32
  }
  func.func @transform_1(%arg0: i32) -> (i32, i32) {
    %c0_i32 = arith.constant 0 : i32
    %c0_i32_0 = arith.constant 0 : i32
    %c0_i32_1 = arith.constant 0 : i32
    return %c0_i32, %c0_i32_0 : i32, i32
  }
  func.func @transform_2(%arg0: i32) -> (i32, i32) {
    %c0_i32 = arith.constant 0 : i32
    %c0_i32_0 = arith.constant 0 : i32
    %c0_i32_1 = arith.constant 0 : i32
    return %c0_i32, %c0_i32_0 : i32, i32
  }
  func.func @transform_3(%arg0: i32) -> (i32, i32) {
    %c0_i32 = arith.constant 0 : i32
    %c0_i32_0 = arith.constant 0 : i32
    return %arg0, %c0_i32 : i32, i32
  }
}

module attributes {stable_mosaic.version = 11 : i64} {
  func.func @_head_kernel(%arg0: i32, %arg1: memref<8x256xf32, #tpu.memory_space<vmem>>, %arg2: memref<8x128xf32, #tpu.memory_space<vmem>>, %arg3: memref<256x16xf32, #tpu.memory_space<vmem>>, %arg4: memref<1x16xf32, #tpu.memory_space<vmem>>, %arg5: memref<16x32xf32, #tpu.memory_space<vmem>>, %arg6: memref<128x32xf32, #tpu.memory_space<vmem>>, %arg7: memref<1x32xf32, #tpu.memory_space<vmem>>, %arg8: memref<32x32xf32, #tpu.memory_space<vmem>>, %arg9: memref<1x32xf32, #tpu.memory_space<vmem>>, %arg10: memref<32x128xf32, #tpu.memory_space<vmem>>, %arg11: memref<1x128xf32, #tpu.memory_space<vmem>>, %arg12: memref<8x128xf32, #tpu.memory_space<vmem>>) attributes {dimension_semantics = [#tpu.dimension_semantics<arbitrary>], iteration_bounds = array<i64: 1>, scalar_prefetch = 0 : i64, scratch_operands = 0 : i64, tpu.core_type = #tpu.core_type<tc>, window_params = [{pipeline_mode = #tpu.pipeline_mode<synchronous>, transform_indices = @transform_0, window_bounds = array<i64: 8, 256>}, {pipeline_mode = #tpu.pipeline_mode<synchronous>, transform_indices = @transform_1, window_bounds = array<i64: 8, 128>}, {pipeline_mode = #tpu.pipeline_mode<synchronous>, transform_indices = @transform_2, window_bounds = array<i64: 256, 16>}, {pipeline_mode = #tpu.pipeline_mode<synchronous>, transform_indices = @transform_3, window_bounds = array<i64: 1, 16>}, {pipeline_mode = #tpu.pipeline_mode<synchronous>, transform_indices = @transform_4, window_bounds = array<i64: 16, 32>}, {pipeline_mode = #tpu.pipeline_mode<synchronous>, transform_indices = @transform_5, window_bounds = array<i64: 128, 32>}, {pipeline_mode = #tpu.pipeline_mode<synchronous>, transform_indices = @transform_6, window_bounds = array<i64: 1, 32>}, {pipeline_mode = #tpu.pipeline_mode<synchronous>, transform_indices = @transform_7, window_bounds = array<i64: 32, 32>}, {pipeline_mode = #tpu.pipeline_mode<synchronous>, transform_indices = @transform_8, window_bounds = array<i64: 1, 32>}, {pipeline_mode = #tpu.pipeline_mode<synchronous>, transform_indices = @transform_9, window_bounds = array<i64: 32, 128>}, {pipeline_mode = #tpu.pipeline_mode<synchronous>, transform_indices = @transform_10, window_bounds = array<i64: 1, 128>}, {pipeline_mode = #tpu.pipeline_mode<synchronous>, transform_indices = @transform_11, window_bounds = array<i64: 8, 128>}]} {
    %c0 = arith.constant 0 : index
    %c0_0 = arith.constant 0 : index
    %0 = vector.load %arg1[%c0, %c0_0] : memref<8x256xf32, #tpu.memory_space<vmem>>, vector<8x256xf32>
    %c0_1 = arith.constant 0 : index
    %c0_2 = arith.constant 0 : index
    %1 = vector.load %arg3[%c0_1, %c0_2] : memref<256x16xf32, #tpu.memory_space<vmem>>, vector<256x16xf32>
    %cst = arith.constant dense<0.000000e+00> : vector<8x16xf32>
    %2 = tpu.matmul %0, %1, %cst {dimension_numbers = #tpu.dot_dimension_numbers<[1], [0], [0], [1], [0, 0, 1, 1], [], []>} : vector<8x256xf32>, vector<256x16xf32>, vector<8x16xf32> -> vector<8x16xf32>
    %c0_3 = arith.constant 0 : index
    %c0_4 = arith.constant 0 : index
    %3 = vector.load %arg4[%c0_3, %c0_4] : memref<1x16xf32, #tpu.memory_space<vmem>>, vector<1x16xf32>
    %4 = vector.broadcast %3 : vector<1x16xf32> to vector<8x16xf32>
    %5 = arith.addf %2, %4 : vector<8x16xf32>
    %c0_5 = arith.constant 0 : index
    %c0_6 = arith.constant 0 : index
    %6 = vector.load %arg5[%c0_5, %c0_6] : memref<16x32xf32, #tpu.memory_space<vmem>>, vector<16x32xf32>
    %cst_7 = arith.constant dense<0.000000e+00> : vector<8x32xf32>
    %7 = tpu.matmul %5, %6, %cst_7 {dimension_numbers = #tpu.dot_dimension_numbers<[1], [0], [0], [1], [0, 0, 1, 1], [], []>} : vector<8x16xf32>, vector<16x32xf32>, vector<8x32xf32> -> vector<8x32xf32>
    %c0_8 = arith.constant 0 : index
    %c0_9 = arith.constant 0 : index
    %8 = vector.load %arg2[%c0_8, %c0_9] : memref<8x128xf32, #tpu.memory_space<vmem>>, vector<8x128xf32>
    %c0_10 = arith.constant 0 : index
    %c0_11 = arith.constant 0 : index
    %9 = vector.load %arg6[%c0_10, %c0_11] : memref<128x32xf32, #tpu.memory_space<vmem>>, vector<128x32xf32>
    %cst_12 = arith.constant dense<0.000000e+00> : vector<8x32xf32>
    %10 = tpu.matmul %8, %9, %cst_12 {dimension_numbers = #tpu.dot_dimension_numbers<[1], [0], [0], [1], [0, 0, 1, 1], [], []>} : vector<8x128xf32>, vector<128x32xf32>, vector<8x32xf32> -> vector<8x32xf32>
    %11 = arith.addf %7, %10 : vector<8x32xf32>
    %c0_13 = arith.constant 0 : index
    %c0_14 = arith.constant 0 : index
    %12 = vector.load %arg7[%c0_13, %c0_14] : memref<1x32xf32, #tpu.memory_space<vmem>>, vector<1x32xf32>
    %13 = vector.broadcast %12 : vector<1x32xf32> to vector<8x32xf32>
    %14 = arith.addf %11, %13 : vector<8x32xf32>
    %cst_15 = arith.constant 0.000000e+00 : f32
    %15 = vector.broadcast %cst_15 : f32 to vector<8x32xf32>
    %16 = arith.maximumf %14, %15 : vector<8x32xf32>
    %c0_16 = arith.constant 0 : index
    %c0_17 = arith.constant 0 : index
    %17 = vector.load %arg8[%c0_16, %c0_17] : memref<32x32xf32, #tpu.memory_space<vmem>>, vector<32x32xf32>
    %cst_18 = arith.constant dense<0.000000e+00> : vector<8x32xf32>
    %18 = tpu.matmul %16, %17, %cst_18 {dimension_numbers = #tpu.dot_dimension_numbers<[1], [0], [0], [1], [0, 0, 1, 1], [], []>} : vector<8x32xf32>, vector<32x32xf32>, vector<8x32xf32> -> vector<8x32xf32>
    %c0_19 = arith.constant 0 : index
    %c0_20 = arith.constant 0 : index
    %19 = vector.load %arg9[%c0_19, %c0_20] : memref<1x32xf32, #tpu.memory_space<vmem>>, vector<1x32xf32>
    %20 = vector.broadcast %19 : vector<1x32xf32> to vector<8x32xf32>
    %21 = arith.addf %18, %20 : vector<8x32xf32>
    %cst_21 = arith.constant 0.000000e+00 : f32
    %22 = vector.broadcast %cst_21 : f32 to vector<8x32xf32>
    %23 = arith.maximumf %21, %22 : vector<8x32xf32>
    %c0_22 = arith.constant 0 : index
    %c0_23 = arith.constant 0 : index
    %24 = vector.load %arg10[%c0_22, %c0_23] : memref<32x128xf32, #tpu.memory_space<vmem>>, vector<32x128xf32>
    %cst_24 = arith.constant dense<0.000000e+00> : vector<8x128xf32>
    %25 = tpu.matmul %23, %24, %cst_24 {dimension_numbers = #tpu.dot_dimension_numbers<[1], [0], [0], [1], [0, 0, 1, 1], [], []>} : vector<8x32xf32>, vector<32x128xf32>, vector<8x128xf32> -> vector<8x128xf32>
    %c0_25 = arith.constant 0 : index
    %c0_26 = arith.constant 0 : index
    %26 = vector.load %arg11[%c0_25, %c0_26] : memref<1x128xf32, #tpu.memory_space<vmem>>, vector<1x128xf32>
    %27 = vector.broadcast %26 : vector<1x128xf32> to vector<8x128xf32>
    %28 = arith.addf %25, %27 : vector<8x128xf32>
    %c0_27 = arith.constant 0 : index
    %c0_28 = arith.constant 0 : index
    %29 = vector.load %arg12[%c0_27, %c0_28] : memref<8x128xf32, #tpu.memory_space<vmem>>, vector<8x128xf32>
    tpu.vector_store %arg12[%c0_27, %c0_28], %28 {strides = array<i32>} : memref<8x128xf32, #tpu.memory_space<vmem>>, vector<8x128xf32>,
    return
  }
  func.func @transform_0(%arg0: i32) -> (i32, i32) {
    %c0_i32 = arith.constant 0 : i32
    %c0_i32_0 = arith.constant 0 : i32
    %c0_i32_1 = arith.constant 0 : i32
    return %c0_i32, %c0_i32_0 : i32, i32
  }
  func.func @transform_1(%arg0: i32) -> (i32, i32) {
    %c0_i32 = arith.constant 0 : i32
    %c0_i32_0 = arith.constant 0 : i32
    %c0_i32_1 = arith.constant 0 : i32
    return %c0_i32, %c0_i32_0 : i32, i32
  }
  func.func @transform_2(%arg0: i32) -> (i32, i32) {
    %c0_i32 = arith.constant 0 : i32
    %c0_i32_0 = arith.constant 0 : i32
    %c0_i32_1 = arith.constant 0 : i32
    return %c0_i32, %c0_i32_0 : i32, i32
  }
  func.func @transform_3(%arg0: i32) -> (i32, i32) {
    %c0_i32 = arith.constant 0 : i32
    %c0_i32_0 = arith.constant 0 : i32
    %c0_i32_1 = arith.constant 0 : i32
    return %c0_i32, %c0_i32_0 : i32, i32
  }
  func.func @transform_4(%arg0: i32) -> (i32, i32) {
    %c0_i32 = arith.constant 0 : i32
    %c0_i32_0 = arith.constant 0 : i32
    %c0_i32_1 = arith.constant 0 : i32
    return %c0_i32, %c0_i32_0 : i32, i32
  }
  func.func @transform_5(%arg0: i32) -> (i32, i32) {
    %c0_i32 = arith.constant 0 : i32
    %c0_i32_0 = arith.constant 0 : i32
    %c0_i32_1 = arith.constant 0 : i32
    return %c0_i32, %c0_i32_0 : i32, i32
  }
  func.func @transform_6(%arg0: i32) -> (i32, i32) {
    %c0_i32 = arith.constant 0 : i32
    %c0_i32_0 = arith.constant 0 : i32
    %c0_i32_1 = arith.constant 0 : i32
    return %c0_i32, %c0_i32_0 : i32, i32
  }
  func.func @transform_7(%arg0: i32) -> (i32, i32) {
    %c0_i32 = arith.constant 0 : i32
    %c0_i32_0 = arith.constant 0 : i32
    %c0_i32_1 = arith.constant 0 : i32
    return %c0_i32, %c0_i32_0 : i32, i32
  }
  func.func @transform_8(%arg0: i32) -> (i32, i32) {
    %c0_i32 = arith.constant 0 : i32
    %c0_i32_0 = arith.constant 0 : i32
    %c0_i32_1 = arith.constant 0 : i32
    return %c0_i32, %c0_i32_0 : i32, i32
  }
  func.func @transform_9(%arg0: i32) -> (i32, i32) {
    %c0_i32 = arith.constant 0 : i32
    %c0_i32_0 = arith.constant 0 : i32
    %c0_i32_1 = arith.constant 0 : i32
    return %c0_i32, %c0_i32_0 : i32, i32
  }
  func.func @transform_10(%arg0: i32) -> (i32, i32) {
    %c0_i32 = arith.constant 0 : i32
    %c0_i32_0 = arith.constant 0 : i32
    %c0_i32_1 = arith.constant 0 : i32
    return %c0_i32, %c0_i32_0 : i32, i32
  }
  func.func @transform_11(%arg0: i32) -> (i32, i32) {
    %c0_i32 = arith.constant 0 : i32
    %c0_i32_0 = arith.constant 0 : i32
    %c0_i32_1 = arith.constant 0 : i32
    return %c0_i32, %c0_i32_0 : i32, i32
  }
}

</mosaic_0001>

<bundles_post_ra>
// kernel: vae_critic_forward.4
= control target key start
LH: loop header
LB: loop body
LE: loop exit
PB: predicated region body
PF: predicated region fallthrough
CT: control target
= control target key end

     0   :  { %s467_s12 = smov 0   ;;  %s542_s0 = inlined_call_operand.vmem [shape: f32[32,128], index: 0, kind: input, shape index: {}]   ;;  %s543_s1 = inlined_call_operand.vmem [shape: f32[128,128], index: 1, kind: input, shape index: {}]   ;;  %s544_s2 = inlined_call_operand.vmem [shape: f32[1,128], index: 2, kind: input, shape index: {}]   ;;  %s545_s3 = inlined_call_operand.vmem [shape: f32[32,128], index: 3, kind: output, shape index: {}]  }
   0x1 LB: > { %s334_s13 = sadd.s32 4294967295, %s445_s12   ;;  %p338_p0 = scmp.ge.s32.totalorder %s445_s12, 1  ;;  %s445_s12 = sphi %s467_s12, %s13_s12  }
   0x2   : > { %p138_p1 = scmp.lt.s32.totalorder %s445_s12, 3 }
   0x4   : > { %p139_p2 = pnand %p338_p0, %p138_p1 }
   0x5   : > { %v176_v0 = vld [vmem:[%s543_s1] sm:$0xff] (!%p139_p2)  ;;  %v177_v1 = vld [vmem:[%s543_s1 + $0x8] sm:$0xff] (!%p139_p2)  ;;  %v178_v2 = vld [vmem:[%s543_s1 + $0x10] sm:$0xff] (!%p139_p2)  ;;  %s339_s20 = sshll.u32 (!%p139_p2), %s334_s13, 1 }
   0x6   : > { %142 = sbr.rel (%p139_p2) target bundleno = 258 (0x102), region = 32  ;;  %v399_v3 = vpack.c.bf16 (!%p139_p2), %v177_v1, %v176_v0  ;;  %v179_v4 = vld [vmem:[%s543_s1 + $0x18] sm:$0xff] (!%p139_p2)  ;;  %p163_p3 = scmp.lt.s32.totalorder (!%p139_p2), %s339_s20, 3  ;;  %v180_v6 = vld [vmem:[%s543_s1 + $0x20] sm:$0xff] (!%p139_p2)  ;;  %v181_v7 = vld [vmem:[%s543_s1 + $0x28] sm:$0xff] (!%p139_p2) }
   0x7   : > { %v403_v5 = vpack.c.bf16 (!%p139_p2), %v179_v4, %v178_v2  ;;  %v407_v8 = vpack.c.bf16 (!%p139_p2), %v181_v7, %v180_v6  ;;  %v182_v9 = vld [vmem:[%s543_s1 + $0x30] sm:$0xff] (!%p139_p2)  ;;  %v183_v10 = vld [vmem:[%s543_s1 + $0x38] sm:$0xff] (!%p139_p2)  ;;  %v184_v13 = vld [vmem:[%s543_s1 + $0x40] sm:$0xff] (!%p139_p2) }
   0x8   : > { %400 = vmatprep.subr.bf16.mxu0 (!%p139_p2), %v399_v3  ;;  %v411_v12 = vpack.c.bf16 (!%p139_p2), %v183_v10, %v182_v9  ;;  %v185_v14 = vld [vmem:[%s543_s1 + $0x48] sm:$0xff] (!%p139_p2)  ;;  %v186_v16 = vld [vmem:[%s543_s1 + $0x50] sm:$0xff] (!%p139_p2)  ;;  %v187_v17 = vld [vmem:[%s543_s1 + $0x58] sm:$0xff] (!%p139_p2) }
   0x9   : > { %402 = vmatpush3.bf16.msra.mxu0 (!%p139_p2), %v399_v3  ;;  %v415_v15 = vpack.c.bf16 (!%p139_p2), %v185_v14, %v184_v13  ;;  %v419_v18 = vpack.c.bf16 (!%p139_p2), %v187_v17, %v186_v16  ;;  %v188_v19 = vld [vmem:[%s543_s1 + $0x60] sm:$0xff] (!%p139_p2)  ;;  %v189_v20 = vld [vmem:[%s543_s1 + $0x68] sm:$0xff] (!%p139_p2)  ;;  %v190_v22 = vld [vmem:[%s543_s1 + $0x70] sm:$0xff] (!%p139_p2) }
   0xa   : > { %404 = vmatprep.subr.bf16.mxu0 (!%p139_p2), %v403_v5  ;;  %v423_v21 = vpack.c.bf16 (!%p139_p2), %v189_v20, %v188_v19  ;;  %v191_v23 = vld [vmem:[%s543_s1 + $0x78] sm:$0xff] (!%p139_p2)  ;;  %v343_v26 = vld [vmem:[%s544_s2] ss:$0 sm:$0xff] (!%p139_p2) }
   0xb   : > { %v427_v24 = vpack.c.bf16 (!%p139_p2), %v191_v23, %v190_v22 }
   0xd   : > { %s547_s20 = smov (!%p163_p3, %s339_s20), 3  ;;  %406 = vmatpush3.bf16.msra.mxu0 %v403_v5 }
   0xe   : > { %s340_s27 = sshll.u32 %s547_s20, 3  ;;  %408 = vmatprep.subr.bf16.mxu0 %v407_v8 }
   0xf   : > { %s166_s7 = scalar_lea.vmem %s542_s0, %s340_s27  ;;  %s172_s4 = scalar_lea.vmem %s545_s3, %s340_s27 }
  0x10   : > { %v174_v11 = vld [vmem:[%s166_s7] sm:$0xff]  ;;  %v175_v25 = vld [vmem:[%s166_s7 + $0x8] sm:$0xff] }
  0x11   : > { %396 = vmatprep.mubr.f32.mxu0 %v174_v11  ;;  %410 = vmatpush3.bf16.msra.mxu0 %v407_v8 }
  0x12   : > { %412 = vmatprep.subr.bf16.mxu0 %v411_v12 }
  0x15   : > { %414 = vmatpush3.bf16.msra.mxu0 %v411_v12 }
  0x16   : > { %416 = vmatprep.subr.bf16.mxu0 %v415_v15 }
  0x19   : > { %418 = vmatpush3.bf16.msra.mxu0 %v415_v15 }
  0x1a   : > { %420 = vmatprep.subr.bf16.mxu0 %v419_v18 }
  0x1d   : > { %422 = vmatpush3.bf16.msra.mxu0 %v419_v18 }
  0x1e   : > { %424 = vmatprep.subr.bf16.mxu0 %v423_v21 }
  0x21   : > { %426 = vmatpush3.bf16.msra.mxu0 %v423_v21 }
  0x22   : > { %428 = vmatprep.subr.bf16.mxu0 %v427_v24 }
  0x25   : > { %430 = vmatpush3.bf16.msra.mxu0 %v427_v24 }
  0x28   : > { %397 = vmatmul.mubr.f32.vlgmr.msra.gmra.mrb[0].mxu0 %v175_v25 }
  0xfb   : > { %v398_v27 = vpop.f32.mrb[0].mxu0 }
  0xfc   : > { %v271_v28 = vadd.f32 %v398_v27, %v343_v26  ;;  %v265_v29 = vpop.f32.mrb[1].mxu0 }
  0xfd   : > { %v266_v30 = vadd.f32 %v343_v26, %v265_v29 }
  0xfe   : > { %v275_v32 = vmax.f32 %v271_v28, 0.0 }
  0xff   : > { %v274_v31 = vmax.f32 %v266_v30, 0.0 }
 0x100   : > { %277 = vst [vmem:[%s172_s4 + $0x8] sm:$0xff] %v275_v32 }
 0x101   : > { %276 = vst [vmem:[%s172_s4] sm:$0xff] %v274_v31 }
 0x102 PF: > { %s13_s12 = sadd.s32 1, %s445_s12  }
 0x103   : > { %p10_p4 = scmp.ge.s32.totalorder %s13_s12, 4  }
 0x105   :  { %12 = sbr.rel (!%p10_p4) target bundleno = 1 (0x1), region = 62 }

// kernel: vae_critic_forward.3
= control target key start
LH: loop header
LB: loop body
LE: loop exit
PB: predicated region body
PF: predicated region fallthrough
CT: control target
= control target key end

     0   :  { %s546_s12 = smov 0   ;;  %s631_s0 = inlined_call_operand.vmem [shape: f32[128,128], index: 0, kind: input, shape index: {}]   ;;  %s632_s1 = inlined_call_operand.vmem [shape: f32[128,128], index: 1, kind: input, shape index: {}]   ;;  %s633_s2 = inlined_call_operand.vmem [shape: f32[1,128], index: 2, kind: input, shape index: {}]   ;;  %s634_s3 = inlined_call_operand.vmem [shape: f32[128,128], index: 3, kind: output, shape index: {}]  }
   0x1 LB: > { %s382_s13 = sadd.s32 4294967295, %s524_s12   ;;  %p386_p0 = scmp.ge.s32.totalorder %s524_s12, 1  ;;  %s524_s12 = sphi %s546_s12, %s13_s12  }
   0x2   : > { %p138_p1 = scmp.lt.s32.totalorder %s524_s12, 3 }
   0x4   : > { %p139_p2 = pnand %p386_p0, %p138_p1 }
   0x5   : > { %v182_v0 = vld [vmem:[%s632_s1] sm:$0xff] (!%p139_p2)  ;;  %v183_v1 = vld [vmem:[%s632_s1 + $0x8] sm:$0xff] (!%p139_p2)  ;;  %v184_v2 = vld [vmem:[%s632_s1 + $0x10] sm:$0xff] (!%p139_p2)  ;;  %s387_s20 = sshll.u32 (!%p139_p2), %s382_s13, 3 }
   0x6   : > { %142 = sbr.rel (%p139_p2) target bundleno = 263 (0x107), region = 32  ;;  %v462_v3 = vpack.c.bf16 (!%p139_p2), %v183_v1, %v182_v0  ;;  %v185_v4 = vld [vmem:[%s632_s1 + $0x18] sm:$0xff] (!%p139_p2)  ;;  %p163_p3 = scmp.lt.s32.totalorder (!%p139_p2), %s387_s20, 15  ;;  %v186_v6 = vld [vmem:[%s632_s1 + $0x20] sm:$0xff] (!%p139_p2)  ;;  %v187_v7 = vld [vmem:[%s632_s1 + $0x28] sm:$0xff] (!%p139_p2) }
   0x7   : > { %v466_v5 = vpack.c.bf16 (!%p139_p2), %v185_v4, %v184_v2  ;;  %v470_v8 = vpack.c.bf16 (!%p139_p2), %v187_v7, %v186_v6  ;;  %v188_v9 = vld [vmem:[%s632_s1 + $0x30] sm:$0xff] (!%p139_p2)  ;;  %v189_v10 = vld [vmem:[%s632_s1 + $0x38] sm:$0xff] (!%p139_p2)  ;;  %v190_v14 = vld [vmem:[%s632_s1 + $0x40] sm:$0xff] (!%p139_p2) }
   0x8   : > { %463 = vmatprep.subr.bf16.mxu0 (!%p139_p2), %v462_v3  ;;  %494 = vmatprep.subr.bf16.mxu1 (!%p139_p2), %v462_v3  ;;  %v474_v13 = vpack.c.bf16 (!%p139_p2), %v189_v10, %v188_v9  ;;  %v191_v15 = vld [vmem:[%s632_s1 + $0x48] sm:$0xff] (!%p139_p2)  ;;  %v192_v17 = vld [vmem:[%s632_s1 + $0x50] sm:$0xff] (!%p139_p2)  ;;  %v193_v18 = vld [vmem:[%s632_s1 + $0x58] sm:$0xff] (!%p139_p2) }
   0x9   : > { %465 = vmatpush3.bf16.msra.mxu0 (!%p139_p2), %v462_v3  ;;  %502 = vmatpush3.bf16.msra.mxu1 (!%p139_p2), %v462_v3  ;;  %v478_v16 = vpack.c.bf16 (!%p139_p2), %v191_v15, %v190_v14  ;;  %v482_v19 = vpack.c.bf16 (!%p139_p2), %v193_v18, %v192_v17  ;;  %v194_v20 = vld [vmem:[%s632_s1 + $0x60] sm:$0xff] (!%p139_p2)  ;;  %v195_v21 = vld [vmem:[%s632_s1 + $0x68] sm:$0xff] (!%p139_p2)  ;;  %v196_v23 = vld [vmem:[%s632_s1 + $0x70] sm:$0xff] (!%p139_p2) }
   0xa   : > { %467 = vmatprep.subr.bf16.mxu0 (!%p139_p2), %v466_v5  ;;  %495 = vmatprep.subr.bf16.mxu1 (!%p139_p2), %v466_v5  ;;  %v486_v22 = vpack.c.bf16 (!%p139_p2), %v195_v21, %v194_v20  ;;  %v197_v24 = vld [vmem:[%s632_s1 + $0x78] sm:$0xff] (!%p139_p2)  ;;  %v391_v32 = vld [vmem:[%s633_s2] ss:$0 sm:$0xff] (!%p139_p2) }
   0xb   : > { %v490_v25 = vpack.c.bf16 (!%p139_p2), %v197_v24, %v196_v23 }
   0xd   : > { %s636_s20 = smov (!%p163_p3, %s387_s20), 15  ;;  %469 = vmatpush3.bf16.msra.mxu0 %v466_v5  ;;  %503 = vmatpush3.bf16.msra.mxu1 %v466_v5 }
   0xe   : > { %s388_s27 = sshll.u32 %s636_s20, 3  ;;  %471 = vmatprep.subr.bf16.mxu0 %v470_v8  ;;  %496 = vmatprep.subr.bf16.mxu1 %v470_v8 }
   0xf   : > { %s586_s7 = scalar_lea.vmem %s631_s0, %s388_s27  ;;  %s172_s4 = scalar_lea.vmem %s634_s3, %s388_s27 }
  0x10   : > { %v174_v11 = vld [vmem:[%s586_s7] sm:$0xff]  ;;  %v175_v26 = vld [vmem:[%s586_s7 + $0x8] sm:$0xff]  ;;  %v176_v28 = vld [vmem:[%s586_s7 + $0x10] sm:$0xff] }
  0x11   : > { %v178_v12 = vld [vmem:[%s586_s7 + $0x20] sm:$0xff]  ;;  %450 = vmatprep.mubr.f32.mxu0 %v174_v11  ;;  %473 = vmatpush3.bf16.msra.mxu0 %v470_v8  ;;  %v179_v27 = vld [vmem:[%s586_s7 + $0x28] sm:$0xff]  ;;  %v180_v29 = vld [vmem:[%s586_s7 + $0x30] sm:$0xff] }
  0x12   : > { %456 = vmatprep.mubr.f32.mxu1 %v178_v12  ;;  %504 = vmatpush3.bf16.msra.mxu1 %v470_v8  ;;  %v177_v30 = vld [vmem:[%s586_s7 + $0x18] sm:$0xff] }
  0x13   : > { %475 = vmatprep.subr.bf16.mxu0 %v474_v13  ;;  %497 = vmatprep.subr.bf16.mxu1 %v474_v13  ;;  %v181_v31 = vld [vmem:[%s586_s7 + $0x38] sm:$0xff] }
  0x15   : > { %477 = vmatpush3.bf16.msra.mxu0 %v474_v13 }
  0x16   : > { %505 = vmatpush3.bf16.msra.mxu1 %v474_v13  ;;  %479 = vmatprep.subr.bf16.mxu0 %v478_v16 }
  0x17   : > { %498 = vmatprep.subr.bf16.mxu1 %v478_v16 }
  0x19   : > { %481 = vmatpush3.bf16.msra.mxu0 %v478_v16 }
  0x1a   : > { %506 = vmatpush3.bf16.msra.mxu1 %v478_v16  ;;  %483 = vmatprep.subr.bf16.mxu0 %v482_v19 }
  0x1b   : > { %499 = vmatprep.subr.bf16.mxu1 %v482_v19 }
  0x1d   : > { %485 = vmatpush3.bf16.msra.mxu0 %v482_v19 }
  0x1e   : > { %507 = vmatpush3.bf16.msra.mxu1 %v482_v19  ;;  %487 = vmatprep.subr.bf16.mxu0 %v486_v22 }
  0x1f   : > { %500 = vmatprep.subr.bf16.mxu1 %v486_v22 }
  0x21   : > { %489 = vmatpush3.bf16.msra.mxu0 %v486_v22 }
  0x22   : > { %508 = vmatpush3.bf16.msra.mxu1 %v486_v22  ;;  %491 = vmatprep.subr.bf16.mxu0 %v490_v25 }
  0x23   : > { %501 = vmatprep.subr.bf16.mxu1 %v490_v25 }
  0x25   : > { %493 = vmatpush3.bf16.msra.mxu0 %v490_v25 }
  0x26   : > { %509 = vmatpush3.bf16.msra.mxu1 %v490_v25 }
  0x28   : > { %451 = vmatmul.mubr.f32.vlgmr.msra.gmra.mrb[0].mxu0 %v175_v26 }
  0x29   : > { %457 = vmatmul.mubr.f32.vlgmr.msra.gmra.mrb[0].mxu1 %v179_v27  ;;  %453 = vmatprep.mubr.f32.mxu0 %v176_v28 }
  0x2a   : > { %459 = vmatprep.mubr.f32.mxu1 %v180_v29 }
  0x2c   : > { %454 = vmatmul.mubr.f32.gmra.mrb[2].mxu0 %v177_v30 }
  0x2d   : > { %460 = vmatmul.mubr.f32.gmra.mrb[2].mxu1 %v181_v31 }
  0xfb   : > { %v452_v33 = vpop.f32.mrb[0].mxu0 }
  0xfc   : > { %v458_v34 = vpop.f32.mrb[0].mxu1  ;;  %v277_v35 = vadd.f32 %v452_v33, %v391_v32  ;;  %v271_v37 = vpop.f32.mrb[1].mxu0 }
  0xfd   : > { %v297_v36 = vadd.f32 %v458_v34, %v391_v32  ;;  %v291_v38 = vpop.f32.mrb[1].mxu1  ;;  %v272_v39 = vadd.f32 %v391_v32, %v271_v37 }
  0xfe   : > { %v292_v40 = vadd.f32 %v391_v32, %v291_v38  ;;  %v311_v41 = vmax.f32 %v277_v35, 0.0 }
  0xff   : > { %v315_v42 = vmax.f32 %v297_v36, 0.0  ;;  %v310_v43 = vmax.f32 %v272_v39, 0.0  ;;  %v455_v45 = vpop.f32.mrb[2].mxu0 }
 0x100   : > { %v314_v44 = vmax.f32 %v292_v40, 0.0  ;;  %v461_v46 = vpop.f32.mrb[2].mxu1  ;;  %319 = vst [vmem:[%s172_s4 + $0x8] sm:$0xff] %v311_v41  ;;  %v287_v47 = vadd.f32 %v455_v45, %v391_v32  ;;  %v281_v49 = vpop.f32.mrb[3].mxu0 }
 0x101   : > { %323 = vst [vmem:[%s172_s4 + $0x28] sm:$0xff] %v315_v42  ;;  %v307_v48 = vadd.f32 %v461_v46, %v391_v32  ;;  %v301_v50 = vpop.f32.mrb[3].mxu1  ;;  %318 = vst [vmem:[%s172_s4] sm:$0xff] %v310_v43  ;;  %v282_v51 = vadd.f32 %v391_v32, %v281_v49 }
 0x102   : > { %322 = vst [vmem:[%s172_s4 + $0x20] sm:$0xff] %v314_v44  ;;  %v302_v52 = vadd.f32 %v391_v32, %v301_v50  ;;  %v313_v53 = vmax.f32 %v287_v47, 0.0 }
 0x103   : > { %v317_v54 = vmax.f32 %v307_v48, 0.0  ;;  %v312_v55 = vmax.f32 %v282_v51, 0.0 }
 0x104   : > { %v316_v56 = vmax.f32 %v302_v52, 0.0  ;;  %321 = vst [vmem:[%s172_s4 + $0x18] sm:$0xff] %v313_v53 }
 0x105   : > { %325 = vst [vmem:[%s172_s4 + $0x38] sm:$0xff] %v317_v54  ;;  %320 = vst [vmem:[%s172_s4 + $0x10] sm:$0xff] %v312_v55 }
 0x106   : > { %324 = vst [vmem:[%s172_s4 + $0x30] sm:$0xff] %v316_v56 }
 0x107 PF: > { %s13_s12 = sadd.s32 1, %s524_s12  }
 0x108   : > { %p10_p4 = scmp.ge.s32.totalorder %s13_s12, 4  }
 0x10a   :  { %12 = sbr.rel (!%p10_p4) target bundleno = 1 (0x1), region = 62 }

// kernel: vae_critic_forward.5
= control target key start
LH: loop header
LB: loop body
LE: loop exit
PB: predicated region body
PF: predicated region fallthrough
CT: control target
= control target key end

     0   :  { %v706_v3 = vmov 0.0|0.0   ;;  %vm707_vm0 = vmmov 0   ;;  %vm238_vm1 = vcmask 130048   ;;  %vm332_vm2 = vcmask 261120   ;;  %s984_s2 = inlined_call_operand.vmem [shape: f32[256,16], index: 2, kind: input, shape index: {}]   ;;  %s985_s0 = inlined_call_operand.vmem [shape: f32[8,256], index: 0, kind: input, shape index: {}]   ;;  %s986_s5 = inlined_call_operand.vmem [shape: f32[128,32], index: 5, kind: input, shape index: {}]   ;;  %s987_s4 = inlined_call_operand.vmem [shape: f32[16,32], index: 4, kind: input, shape index: {}]   ;;  %s988_s1 = inlined_call_operand.vmem [shape: f32[8,128], index: 1, kind: input, shape index: {}]   ;;  %s989_s3 = inlined_call_operand.vmem [shape: f32[1,16], index: 3, kind: input, shape index: {}]   ;;  %s990_s7 = inlined_call_operand.vmem [shape: f32[32,32], index: 7, kind: input, shape index: {}]   ;;  %s991_s9 = inlined_call_operand.vmem [shape: f32[32,128], index: 9, kind: input, shape index: {}]   ;;  %s992_s6 = inlined_call_operand.vmem [shape: f32[1,32], index: 6, kind: input, shape index: {}]   ;;  %s993_s8 = inlined_call_operand.vmem [shape: f32[1,32], index: 8, kind: input, shape index: {}]   ;;  %s994_s10 = inlined_call_operand.vmem [shape: f32[1,128], index: 10, kind: input, shape index: {}]   ;;  %s995_s11 = inlined_call_operand.vmem [shape: f32[8,128], index: 11, kind: output, shape index: {}]  }
   0x1   :  { %v56_v0 = vld [vmem:[%s984_s2 + $0x80] sm:$0xff]  ;;  %v57_v1 = vld [vmem:[%s984_s2 + $0x88] sm:$0xff]  ;;  %664 = vmatprep.subr.bf16.mxu1 %v706_v3  ;;  %v58_v6 = vld [vmem:[%s984_s2 + $0x90] sm:$0xff] }
   0x2   :  { %v40_v2 = vld [vmem:[%s984_s2] sm:$0xff]  ;;  %v632_v4 = vpack.c.bf16 %v57_v1, %v56_v0  ;;  %v41_v5 = vld [vmem:[%s984_s2 + $0x8] sm:$0xff]  ;;  %v59_v7 = vld [vmem:[%s984_s2 + $0x98] sm:$0xff] }
   0x3   :  { %v634_v8 = vpack.c.bf16 %v41_v5, %v40_v2  ;;  %v636_v9 = vpack.c.bf16 %v59_v7, %v58_v6  ;;  %v42_v10 = vld [vmem:[%s984_s2 + $0x10] sm:$0xff]  ;;  %v43_v11 = vld [vmem:[%s984_s2 + $0x18] sm:$0xff]  ;;  %v60_v12 = vld [vmem:[%s984_s2 + $0xa0] sm:$0xff] }
   0x4   :  { %633 = vmatprep.subr.bf16.mxu0 %v632_v4  ;;  %v61_v13 = vld [vmem:[%s984_s2 + $0xa8] sm:$0xff]  ;;  %v638_v14 = vpack.c.bf16 %v43_v11, %v42_v10  ;;  %v44_v16 = vld [vmem:[%s984_s2 + $0x20] sm:$0xff]  ;;  %v62_v18 = vld [vmem:[%s984_s2 + $0xb0] sm:$0xff] }
   0x5   :  { %635 = vmatpush3.bf16.msra.mxu0 %v634_v8  ;;  %v640_v15 = vpack.c.bf16 %v61_v13, %v60_v12  ;;  %v45_v17 = vld [vmem:[%s984_s2 + $0x28] sm:$0xff]  ;;  %v63_v19 = vld [vmem:[%s984_s2 + $0xb8] sm:$0xff]  ;;  %v46_v22 = vld [vmem:[%s984_s2 + $0x30] sm:$0xff] }
   0x6   :  { %637 = vmatprep.subr.bf16.mxu0 %v636_v9  ;;  %v642_v20 = vpack.c.bf16 %v45_v17, %v44_v16  ;;  %v644_v21 = vpack.c.bf16 %v63_v19, %v62_v18  ;;  %v47_v23 = vld [vmem:[%s984_s2 + $0x38] sm:$0xff]  ;;  %v64_v24 = vld [vmem:[%s984_s2 + $0xc0] sm:$0xff]  ;;  %v65_v25 = vld [vmem:[%s984_s2 + $0xc8] sm:$0xff] }
   0x7   :  { %v39_v26 = vld [vmem:[%s985_s0 + $0x8] sm:$0xff]  ;;  %v152_v27 = vld [vmem:[%s986_s5] sm:$0xff]  ;;  %v646_v29 = vpack.c.bf16 %v47_v23, %v46_v22  ;;  %v154_v31 = vld [vmem:[%s986_s5 + $0x10] sm:$0xff]  ;;  %v648_v33 = vpack.c.bf16 %v65_v25, %v64_v24 }
   0x8   :  { %143 = vmatprep.mubr.f32.mxu0 %v39_v26  ;;  %v153_v28 = vld [vmem:[%s986_s5 + $0x8] sm:$0xff]  ;;  %v155_v32 = vld [vmem:[%s986_s5 + $0x18] sm:$0xff]  ;;  %v48_v34 = vld [vmem:[%s984_s2 + $0x40] sm:$0xff] }
   0x9   :  { %639 = vmatpush3.bf16.msra.mxu0 %v638_v14  ;;  %v665_v30 = vpack.c.bf16 %v153_v28, %v152_v27  ;;  %v49_v35 = vld [vmem:[%s984_s2 + $0x48] sm:$0xff]  ;;  %v66_v36 = vld [vmem:[%s984_s2 + $0xd0] sm:$0xff]  ;;  %v67_v37 = vld [vmem:[%s984_s2 + $0xd8] sm:$0xff]  ;;  %v668_v38 = vpack.c.bf16 %v155_v32, %v154_v31 }
   0xa   :  { %641 = vmatprep.subr.bf16.mxu0 %v640_v15  ;;  %v156_v39 = vld [vmem:[%s986_s5 + $0x20] sm:$0xff]  ;;  %v157_v40 = vld [vmem:[%s986_s5 + $0x28] sm:$0xff]  ;;  %v650_v41 = vpack.c.bf16 %v49_v35, %v48_v34  ;;  %v652_v42 = vpack.c.bf16 %v67_v37, %v66_v36  ;;  %v50_v43 = vld [vmem:[%s984_s2 + $0x50] sm:$0xff]  ;;  %v708_v15 = vmov 0.0  }
   0xb   :  { %666 = vmatpush3.bf16.msra.mxu1 %v665_v30  ;;  %v51_v44 = vld [vmem:[%s984_s2 + $0x58] sm:$0xff]  ;;  %v68_v45 = vld [vmem:[%s984_s2 + $0xe0] sm:$0xff]  ;;  %v69_v46 = vld [vmem:[%s984_s2 + $0xe8] sm:$0xff]  ;;  %v671_v47 = vpack.c.bf16 %v157_v40, %v156_v39  ;;  %600 = vmatprep.mubr.msk.f32.mxu1 %vm707_vm0, %v708_v15 }
   0xc   :  { %667 = vmatprep.subr.bf16.mxu1 %v706_v3  ;;  %v158_v48 = vld [vmem:[%s986_s5 + $0x30] sm:$0xff]  ;;  %v159_v49 = vld [vmem:[%s986_s5 + $0x38] sm:$0xff]  ;;  %v654_v50 = vpack.c.bf16 %v51_v44, %v50_v43  ;;  %v656_v51 = vpack.c.bf16 %v69_v46, %v68_v45  ;;  %v52_v52 = vld [vmem:[%s984_s2 + $0x60] sm:$0xff] }
   0xd   :  { %643 = vmatpush3.bf16.msra.mxu0 %v642_v20  ;;  %v53_v53 = vld [vmem:[%s984_s2 + $0x68] sm:$0xff]  ;;  %v70_v54 = vld [vmem:[%s984_s2 + $0xf0] sm:$0xff]  ;;  %v71_v55 = vld [vmem:[%s984_s2 + $0xf8] sm:$0xff]  ;;  %v674_v56 = vpack.c.bf16 %v159_v49, %v158_v48 }
   0xe   :  { %645 = vmatprep.subr.bf16.mxu0 %v644_v21  ;;  %v160_v57 = vld [vmem:[%s986_s5 + $0x40] sm:$0xff]  ;;  %v161_v58 = vld [vmem:[%s986_s5 + $0x48] sm:$0xff]  ;;  %v658_v59 = vpack.c.bf16 %v53_v53, %v52_v52  ;;  %v660_v60 = vpack.c.bf16 %v71_v55, %v70_v54  ;;  %v54_v61 = vld [vmem:[%s984_s2 + $0x70] sm:$0xff] }
   0xf   :  { %669 = vmatpush3.bf16.msra.mxu1 %v668_v38  ;;  %v55_v62 = vld [vmem:[%s984_s2 + $0x78] sm:$0xff]  ;;  %v677_v63 = vpack.c.bf16 %v161_v58, %v160_v57  ;;  %v162_v0 = vld [vmem:[%s986_s5 + $0x50] sm:$0xff]  ;;  %v164_v5 = vld [vmem:[%s986_s5 + $0x60] sm:$0xff] }
  0x10   :  { %670 = vmatprep.subr.bf16.mxu1 %v706_v3  ;;  %v163_v1 = vld [vmem:[%s986_s5 + $0x58] sm:$0xff]  ;;  %v662_v2 = vpack.c.bf16 %v55_v62, %v54_v61  ;;  %v165_v6 = vld [vmem:[%s986_s5 + $0x68] sm:$0xff]  ;;  %v38_v7 = vld [vmem:[%s985_s0] sm:$0xff] }
  0x11   :  { %647 = vmatpush3.bf16.msra.mxu0 %v646_v29  ;;  %v680_v4 = vpack.c.bf16 %v163_v1, %v162_v0  ;;  %v683_v8 = vpack.c.bf16 %v165_v6, %v164_v5  ;;  %v166_v9 = vld [vmem:[%s986_s5 + $0x70] sm:$0xff]  ;;  %v167_v10 = vld [vmem:[%s986_s5 + $0x78] sm:$0xff]  ;;  %v149_v12 = vld [vmem:[%s987_s4] sm:$0xff] }
  0x12   :  { %649 = vmatprep.subr.bf16.mxu0 %v648_v33  ;;  %v686_v11 = vpack.c.bf16 %v167_v10, %v166_v9  ;;  %v150_v13 = vld [vmem:[%s987_s4 + $0x8] sm:$0xff]  ;;  %v151_v16 = vld [vmem:[%s988_s1] sm:$0xff]  ;;  %v323_v27 = vld [vmem:[%s990_s7 + $0x10] sm:$0xff] }
  0x13   :  { %672 = vmatpush3.bf16.msra.mxu1 %v671_v47  ;;  %v689_v14 = vpack.c.bf16 %v150_v13, %v149_v12  ;;  %v496_v18 = vld [vmem:[%s989_s3] ss:$0 sm:$0xff]  ;;  %v322_v23 = vld [vmem:[%s990_s7 + $0x8] sm:$0xff]  ;;  %v324_v28 = vld [vmem:[%s990_s7 + $0x18] sm:$0xff] }
  0x14   :  { %673 = vmatprep.subr.bf16.mxu1 %v706_v3  ;;  %v321_v22 = vld [vmem:[%s990_s7] sm:$0xff]  ;;  %v695_v29 = vpack.c.bf16 %v324_v28, %v323_v27  ;;  %v408_v31 = vld [vmem:[%s991_s9 + $0x8] sm:$0xff]  ;;  %v409_v39 = vld [vmem:[%s991_s9 + $0x10] sm:$0xff] }
  0x15   :  { %651 = vmatpush3.bf16.msra.mxu0 %v650_v41  ;;  %v692_v24 = vpack.c.bf16 %v322_v23, %v321_v22  ;;  %v407_v30 = vld [vmem:[%s991_s9] sm:$0xff]  ;;  %v410_v40 = vld [vmem:[%s991_s9 + $0x18] sm:$0xff] }
  0x16   :  { %653 = vmatprep.subr.bf16.mxu0 %v652_v42  ;;  %v698_v32 = vpack.c.bf16 %v408_v31, %v407_v30  ;;  %v498_v34 = vld [vmem:[%s992_s6] ss:$0 sm:$0xff] }
  0x17   :  { %675 = vmatpush3.bf16.msra.mxu1 %v674_v56  ;;  %v499_v41 = vld [vmem:[%s993_s8] ss:$0 sm:$0xff] }
  0x18   :  { %676 = vmatprep.subr.bf16.mxu1 %v706_v3  ;;  %v501_v46 = vld [vmem:[%s994_s10] ss:$0 sm:$0xff] }
  0x19   :  { %655 = vmatpush3.bf16.msra.mxu0 %v654_v50 }
  0x1a   :  { %657 = vmatprep.subr.bf16.mxu0 %v656_v51 }
  0x1b   :  { %678 = vmatpush3.bf16.msra.mxu1 %v677_v63 }
  0x1c   :  { %679 = vmatprep.subr.bf16.mxu1 %v706_v3 }
  0x1d   :  { %659 = vmatpush3.bf16.msra.mxu0 %v658_v59 }
  0x1e   :  { %661 = vmatprep.subr.bf16.mxu0 %v660_v60 }
  0x1f   :  { %681 = vmatpush3.bf16.msra.mxu1 %v680_v4 }
  0x20   :  { %682 = vmatprep.subr.bf16.mxu1 %v706_v3 }
  0x21   :  { %663 = vmatpush3.bf16.msra.mxu0 %v662_v2 }
  0x22   :  { %688 = vmatprep.subr.bf16.mxu0 %v706_v3 }
  0x23   :  { %684 = vmatpush3.bf16.msra.mxu1 %v683_v8 }
  0x24   :  { %144 = vmatmul.mubr.f32.vlgmr.msra.gmra.mrb[0].mxu0 %v38_v7  ;;  %685 = vmatprep.subr.bf16.mxu1 %v706_v3 }
  0x25   :  { %690 = vmatpush3.bf16.msra.mxu0 %v689_v14  ;;  %607 = vmatprep.mubr.msk.f32.mxu0 %vm707_vm0, %v708_v15 }
  0x26   :  { %697 = vmatprep.subr.bf16.mxu0 %v706_v3 }
  0x27   :  { %687 = vmatpush3.bf16.msra.mxu1 %v686_v11 }
  0x28   :  { %691 = vmatprep.subr.bf16.mxu1 %v706_v3 }
  0x2a   :  { %601 = vmatmul.mubr.f32.vlgmr.msra.gmra.mrb[0].mxu1 %v151_v16 }
  0x2b   :  { %618 = vmatprep.mubr.msk.f32.mxu1 %vm707_vm0, %v708_v15  ;;  %693 = vmatpush3.bf16.msra.mxu1 %v692_v24 }
  0x2c   :  { %694 = vmatprep.subr.bf16.mxu1 %v706_v3 }
  0x2f   :  { %696 = vmatpush3.bf16.msra.mxu1 %v695_v29 }
  0xf7   :  { %v535_v17 = vpop.f32.mrb[0].mxu0 }
  0xf8   :  { %v536_v19 = vpop.f32.mrb[1].mxu0 }
  0xf9   :  { %v537_v20 = vadd.f32 %v536_v19, %v535_v17 }
  0xfb   :  { %v146_v21 = vadd.f32 %v537_v20, %v496_v18 }
  0xfd   :  { %608 = vmatmul.mubr.msk.f32.vlgmr.msra.gmra.mrb[2].mxu0 %vm238_vm1, %v146_v21  ;;  %v234_v25 = vpop.f32.mrb[0].mxu1 }
  0xfe   :  { %629 = vmatprep.mubr.msk.f32.mxu0 %vm707_vm0, %v708_v15  ;;  %v602_v26 = vpop.f32.mrb[1].mxu1  ;;  %699 = vmatpush3.bf16.msra.mxu0 %v698_v32 }
  0xff   :  { %700 = vmatprep.subr.bf16.mxu0 %v706_v3  ;;  %v701_v3 = vpack.c.bf16 %v410_v40, %v409_v39 }
 0x102   :  { %702 = vmatpush3.bf16.msra.mxu0 %v701_v3 }
 0x1d0   :  { %v308_v33 = vpop.f32.mrb[2].mxu0 }
 0x1d1   :  { %v309_v35 = vadd.f32 %v308_v33, %v234_v25  ;;  %v609_v36 = vpop.f32.mrb[3].mxu0 }
 0x1d3   :  { %v319_v37 = vadd.f32 %v498_v34, %v309_v35 }
 0x1d5   :  { %v320_v38 = vmax.f32 %v319_v37, 0.0 }
 0x1d7   :  { %619 = vmatmul.mubr.msk.f32.vlgmr.msra.gmra.mrb[2].mxu1 %vm332_vm2, %v320_v38 }
 0x2aa   :  { %v402_v42 = vpop.f32.mrb[2].mxu1 }
 0x2ab   :  { %v403_v43 = vadd.f32 %v499_v41, %v402_v42  ;;  %v620_v44 = vpop.f32.mrb[3].mxu1 }
 0x2ad   :  { %v406_v45 = vmax.f32 %v403_v43, 0.0 }
 0x2af   :  { %630 = vmatmul.mubr.msk.f32.vlgmr.msra.gmra.mrb[4].mxu0 %vm332_vm2, %v406_v45 }
 0x382   :  { %v487_v47 = vpop.f32.mrb[4].mxu0 }
 0x383   :  { %v488_v48 = vadd.f32 %v501_v46, %v487_v47  ;;  %v631_v49 = vpop.f32.mrb[5].mxu0 }
 0x385   :  { %491 = vst [vmem:[%s995_s11] sm:$0xff] %v488_v48 }

</bundles_post_ra>
